<compile_context>
chip_gen: v7x
topology: tpu7x:2x2x1
jax: 0.10.0
libtpu: 0.0.40
codegen_flags: <defaults>
</compile_context>

<pallas_src>
import math
import functools

import jax
import jax.numpy as jnp
from jax.experimental import pallas as pl
from jax.experimental.pallas import tpu as pltpu


SQRT_HALF = math.sqrt(0.5)


def _tpu_defaults():
    """Per-generation defaults:
    (t_block, vmem_limit_bytes, prefer_tap_fusion, time_chunks_when_B_is_1)."""
    try:
        kind = jax.devices()[0].device_kind.lower()
    except Exception:
        kind = ""
    if "v7" in kind:
        # v7x: 64 MiB VMEM/TC; MRB accumulates in the MXU result RAM -> prefer
        # K-step accumulation (no slab scratch), modest tile, capped scoped
        # VMEM, and 2 time chunks so B=1 uses both TensorCores.
        return 512, 48 * 1024 * 1024, False, 2
    if "v5" in kind or "v6" in kind:
        # v5e/v6e: 128 MiB physical VMEM -> a larger time tile amortizes the
        # ~0.35us per-grid-step overhead; the slab keeps the K taps on one
        # matmul (MRF would otherwise cost K-1 VPU accumulation passes).
        return 1024, 64 * 1024 * 1024, True, 1
    return 512, None, True, 1


def _glu_block_kernel_fused(halo_ref, x_ref, wg_ref, bg_ref, wos_ref, bos_ref,
                            out_ref, skip_ref, window_ref, *slab,
                            kernel_size, dilation, pad, pad_al, ch, cres,
                            fuse_taps):
    """Lane-aligned path (Cres, Ch, Cskip all multiples of 128).

    halo_ref  : (pad_al, Cres)     causal halo seed for the current time chunk
    x_ref     : (tb, Cres)         input tile (compute dtype)
    wg_ref    : (K*Cres, Cgate)    fused dilated-conv weight (tanh|sigmoid cols)
    bg_ref    : (1, Cgate)         f32 bias
    wos_ref   : (Ch, Cres+Cskip)   fused 1x1 weight (res|skip cols)
    bos_ref   : (1, Cres+Cskip)    f32 bias
    window_ref: (pad_al+tb, Cres)  persistent scratch; rows [pad_al-pad, pad_al)
                                   carry the causal halo between time blocks
    slab      : optional (tb, K*Cres) scratch when fuse_taps
    """
    t = pl.program_id(2)
    K, d = kernel_size, dilation
    tb = x_ref.shape[0]
    base = pad_al - pad                      # first live halo row

    # Seed the halo at the first time block of every (batch, chunk): zeros for
    # the first chunk, the preceding `pad` input frames otherwise.
    @pl.when(t == 0)
    def _():
        window_ref[0:pad_al, :] = halo_ref[...]

    x = x_ref[...]
    window_ref[pad_al:pad_al + tb, :] = x    # sublane-aligned bulk store

    if fuse_taps:
        # One (tb, K*Cres) x (K*Cres, Cgate) matmul (v5e/v6e friendly).
        slab_ref = slab[0]
        for k in range(K - 1):
            slab_ref[:, k * cres:(k + 1) * cres] = \
                window_ref[base + k * d: base + k * d + tb, :]
        slab_ref[:, (K - 1) * cres:K * cres] = x     # last tap is x itself
        fg = jnp.dot(slab_ref[...], wg_ref[...],
                     preferred_element_type=jnp.float32)
    else:
        # K-step accumulation (preferred on v7x: MRB accumulates in the MXU).
        fg = jnp.dot(x, wg_ref[(K - 1) * cres:K * cres, :],
                     preferred_element_type=jnp.float32)
        for k in range(K - 1):
            xk = window_ref[base + k * d: base + k * d + tb, :]
            fg = fg + jnp.dot(xk, wg_ref[k * cres:(k + 1) * cres, :],
                              preferred_element_type=jnp.float32)

    # Carry the halo AFTER all tap reads.  The copy goes through a value temp,
    # which keeps the pad > t_block overlapping case safe.
    new_halo = window_ref[pad_al + tb - pad: pad_al + tb, :]
    window_ref[base:pad_al, :] = new_halo

    fg = fg + bg_ref[...]
    f = fg[:, :ch]                           # Ch multiple of 128 -> aligned
    g = fg[:, ch:]
    h = (jnp.tanh(f) * jax.nn.sigmoid(g)).astype(x.dtype)   # GLU math in f32

    # One fused 1x1 matmul for (res | skip): fills the 256-wide MXU N tile.
    os = jnp.dot(h, wos_ref[...],
                 preferred_element_type=jnp.float32) + bos_ref[...]
    o = os[:, :cres]
    s = os[:, cres:]
    out_ref[...] = ((o + x.astype(jnp.float32)) * SQRT_HALF).astype(out_ref.dtype)
    skip_ref[...] = s.astype(skip_ref.dtype)


def _glu_block_kernel_small(halo_ref, x_ref, wa_ref, ba_ref, wb_ref, bb_ref,
                            wout_ref, bout_ref, wskip_ref, bskip_ref,
                            out_ref, skip_ref, window_ref,
                            *, kernel_size, dilation, pad, pad_al):
    """Fallback for small / non-lane-aligned channel counts: GLU split is done
    on pre-split weights (no unaligned lane slicing in-kernel)."""
    t = pl.program_id(2)
    K, d = kernel_size, dilation
    tb, cres = x_ref.shape
    base = pad_al - pad

    @pl.when(t == 0)
    def _():
        window_ref[0:pad_al, :] = halo_ref[...]

    x = x_ref[...]
    window_ref[pad_al:pad_al + tb, :] = x

    # Tiny weights: load once and value-slice per tap.
    wa = wa_ref[...]
    wb = wb_ref[...]

    a = jnp.dot(x, wa[(K - 1) * cres:K * cres, :],
                preferred_element_type=jnp.float32)
    b = jnp.dot(x, wb[(K - 1) * cres:K * cres, :],
                preferred_element_type=jnp.float32)
    for k in range(K - 1):
        xk = window_ref[base + k * d: base + k * d + tb, :]
        a = a + jnp.dot(xk, wa[k * cres:(k + 1) * cres, :],
                        preferred_element_type=jnp.float32)
        b = b + jnp.dot(xk, wb[k * cres:(k + 1) * cres, :],
                        preferred_element_type=jnp.float32)

    # Halo carry after all tap reads (value temp handles pad > tb overlap).
    new_halo = window_ref[pad_al + tb - pad: pad_al + tb, :]
    window_ref[base:pad_al, :] = new_halo

    a = a + ba_ref[...]
    b = b + bb_ref[...]
    h = (jnp.tanh(a) * jax.nn.sigmoid(b)).astype(x.dtype)

    s = jnp.dot(h, wskip_ref[...],
                preferred_element_type=jnp.float32) + bskip_ref[...]
    o = jnp.dot(h, wout_ref[...],
                preferred_element_type=jnp.float32) + bout_ref[...]
    out_ref[...] = ((o + x.astype(jnp.float32)) * SQRT_HALF).astype(out_ref.dtype)
    skip_ref[...] = s.astype(skip_ref.dtype)


def residual_glu_block_tc(x_btc, params, *, kernel_size, dilation,
                          t_block=None, n_chunks=None, fuse_taps=None,
                          compute_dtype=jnp.bfloat16, vmem_limit_bytes=None):
    """Channels-last core wrapper.

    x_btc: (B, T, Cres).  Returns (out (B,T,Cres), skip (B,T,Cskip)) in
    `compute_dtype`.  A stacked WaveNet should call this per layer and do the
    (B,C,T)<->(B,T,C) transpose once for the whole stack.
    """
    B, T, Cres = x_btc.shape
    K = kernel_size
    pad = (K - 1) * dilation
    assert pad > 0, "kernel_size must be >= 2 (a 1x1 conv is a plain matmul)"

    wconv = params['wconv']                       # (K, Cres, Cgate)
    Cgate = wconv.shape[2]
    Ch = Cgate // 2
    Cskip = params['wskip'].shape[1]

    tb_default, vmem_default, prefer_fuse, chunks_b1 = _tpu_defaults()
    if t_block is None:
        t_block = tb_default
    if vmem_limit_bytes is None:
        vmem_limit_bytes = vmem_default
    if n_chunks is None:
        n_chunks = chunks_b1 if B == 1 else 1

    itemsize = jnp.dtype(compute_dtype).itemsize
    sub = 8 * (4 // itemsize)                     # sublane multiple (8 f32, 16 bf16)
    pad_al = ((pad + sub - 1) // sub) * sub       # sublane-aligned halo rows

    # --- time tiling / chunking --------------------------------------------
    t_block = min(t_block, T)
    if t_block < T:
        t_block = max(sub, (t_block // sub) * sub)
    nt = -(-T // t_block)                         # time blocks needed
    n_chunks = max(1, min(int(n_chunks), nt))     # 'parallel' chunks (v7x 2nd TC)
    npc = -(-nt // n_chunks)                      # blocks per chunk
    chunk_T = npc * t_block
    Tp = n_chunks * chunk_T

    x = x_btc.astype(compute_dtype)
    if Tp != T:
        # End-pad only; causal conv => padded frames never affect valid output.
        x = jnp.pad(x, ((0, 0), (0, Tp - T), (0, 0)))

    # Halo seeds, one (pad_al, Cres) slab per (batch, chunk): last `pad` rows
    # are the frames preceding the chunk (zeros for the first chunk); leading
    # rows are alignment filler and never read.
    xz = jnp.pad(x, ((0, 0), (pad_al, 0), (0, 0)))
    halo_seed = jnp.stack(
        [xz[:, c * chunk_T: c * chunk_T + pad_al, :] for c in range(n_chunks)],
        axis=1)                                   # (B, n_chunks, pad_al, Cres)

    # --- weights -------------------------------------------------------------
    # For production sizes keep Cres/Ch/Cskip multiples of 128 (lane dense) so
    # the fused path applies and output stores are unmasked.
    lane_aligned = (Cres % 128 == 0) and (Ch % 128 == 0) and (Cskip % 128 == 0)
    if fuse_taps is None:
        fuse_taps = prefer_fuse and lane_aligned
    else:
        fuse_taps = bool(fuse_taps) and lane_aligned

    f32 = jnp.float32
    if lane_aligned:
        wgate = wconv.reshape(K * Cres, Cgate).astype(compute_dtype)
        bgate = params['bconv'].astype(f32)
        w_os = jnp.concatenate([params['wout'], params['wskip']],
                               axis=1).astype(compute_dtype)
        b_os = jnp.concatenate([params['bout'], params['bskip']],
                               axis=1).astype(f32)
        weights = (wgate, bgate, w_os, b_os)
        kernel = functools.partial(
            _glu_block_kernel_fused, kernel_size=K, dilation=dilation,
            pad=pad, pad_al=pad_al, ch=Ch, cres=Cres, fuse_taps=fuse_taps)
    else:
        w_fused = wconv.reshape(K * Cres, Cgate)
        weights = (w_fused[:, :Ch].astype(compute_dtype),
                   params['bconv'][:, :Ch].astype(f32),
                   w_fused[:, Ch:].astype(compute_dtype),
                   params['bconv'][:, Ch:].astype(f32),
                   params['wout'].astype(compute_dtype),
                   params['bout'].astype(f32),
                   params['wskip'].astype(compute_dtype),
                   params['bskip'].astype(f32))
        kernel = functools.partial(
            _glu_block_kernel_small, kernel_size=K, dilation=dilation,
            pad=pad, pad_al=pad_al)
        fuse_taps = False

    def full_spec(arr):
        # Resident weight: constant block index => fetched once, kept in VMEM.
        # TODO(synk): on v7x add pipeline_mode=pl.Buffered(1) here to
        #             single-buffer the resident weights (VMEM headroom).
        return pl.BlockSpec(arr.shape, lambda b, c, t: (0, 0))

    def time_map(b, c, t):
        return (b, c * npc + t, 0)

    in_specs = [
        pl.BlockSpec((None, None, pad_al, Cres), lambda b, c, t: (b, c, 0, 0)),
        pl.BlockSpec((None, t_block, Cres), time_map),
    ] + [full_spec(w) for w in weights]

    out_specs = (
        pl.BlockSpec((None, t_block, Cres), time_map),
        pl.BlockSpec((None, t_block, Cskip), time_map),
    )
    out_shape = (
        jax.ShapeDtypeStruct((B, Tp, Cres), compute_dtype),
        jax.ShapeDtypeStruct((B, Tp, Cskip), compute_dtype),
    )

    scratch_shapes = [pltpu.VMEM((pad_al + t_block, Cres), compute_dtype)]
    if fuse_taps:
        scratch_shapes.append(pltpu.VMEM((t_block, K * Cres), compute_dtype))

    weight_bytes = sum(int(w.size) * w.dtype.itemsize for w in weights)
    cost = pl.CostEstimate(
        flops=2 * B * Tp * (K * Cres * Cgate + Ch * (Cres + Cskip)),
        transcendentals=2 * B * Tp * Ch,
        bytes_accessed=int(B * Tp * (2 * Cres + Cskip) * itemsize
                           + B * n_chunks * pad_al * Cres * itemsize
                           + weight_bytes),
    )

    cp = dict(dimension_semantics=("parallel", "parallel", "arbitrary"))
    if vmem_limit_bytes is not None:
        cp['vmem_limit_bytes'] = int(vmem_limit_bytes)

    out, skip = pl.pallas_call(
        kernel,
        grid=(B, n_chunks, npc),
        in_specs=in_specs,
        out_specs=out_specs,
        out_shape=out_shape,
        scratch_shapes=scratch_shapes,
        compiler_params=pltpu.CompilerParams(**cp),
        cost_estimate=cost,
    )(halo_seed, x, *weights)

    if Tp != T:
        out = out[:, :T]
        skip = skip[:, :T]
    return out, skip


def residual_conv1d_glu(x_bct, params, *, kernel_size, dilation, **kwargs):
    """PyTorch-layout convenience wrapper: x_bct is (B, Cres, T).

    In a stacked WaveNet, do this transpose once for the whole stack and call
    residual_glu_block_tc layer by layer instead (keeps HBM traffic minimal).
    """
    x_btc = jnp.transpose(x_bct, (0, 2, 1))
    out, skip = residual_glu_block_tc(x_btc, params, kernel_size=kernel_size,
                                      dilation=dilation, **kwargs)
    return jnp.transpose(out, (0, 2, 1)), jnp.transpose(skip, (0, 2, 1))


def reference_forward(x_bct, params, *, kernel_size, dilation):
    """Pure-JAX reference mirroring the PyTorch module (eval mode), (B,C,T)."""
    B, Cres, T = x_bct.shape
    pad = (kernel_size - 1) * dilation
    # lax conv wants weights as (Cout, Cin, K); params['wconv'] is (K, Cin, Cout).
    w = jnp.transpose(params['wconv'], (2, 1, 0))
    y = jax.lax.conv_general_dilated(
        x_bct, w, window_strides=(1,), padding=[(pad, pad)],
        rhs_dilation=(dilation,),
        dimension_numbers=('NCH', 'OIH', 'NCH'))
    y = y + params['bconv'][0][None, :, None]
    y = y[:, :, :T]                                              # causal trim
    half = y.shape[1] // 2
    a, b = y[:, :half, :], y[:, half:, :]
    h = jnp.tanh(a) * jax.nn.sigmoid(b)                          # (B, half, T)
    s = jnp.einsum('bht,hs->bst', h, params['wskip']) + params['bskip'][0][None, :, None]
    o = jnp.einsum('bht,ho->bot', h, params['wout']) + params['bout'][0][None, :, None]
    out = (o + x_bct) * SQRT_HALF
    return out, s


def init_params(key, residual_channels, gate_channels, kernel_size,
                skip_out_channels, dropout):
    """Deterministic init matching the module's Conv1d init (std_mul=1.0,
    bias=0).  weight_norm at init yields the same effective weight."""
    k1, k2, k3 = jax.random.split(key, 3)
    gate_out = gate_channels // 2

    std_conv = math.sqrt(1.0 * (1.0 - dropout) / (kernel_size * residual_channels))
    std_out = math.sqrt(1.0 / gate_out)
    std_skip = math.sqrt(1.0 / gate_out)

    return {
        'wconv': std_conv * jax.random.normal(
            k1, (kernel_size, residual_channels, gate_channels), jnp.float32),
        'bconv': jnp.zeros((1, gate_channels), jnp.float32),
        'wout': std_out * jax.random.normal(
            k2, (gate_out, residual_channels), jnp.float32),
        'bout': jnp.zeros((1, residual_channels), jnp.float32),
        'wskip': std_skip * jax.random.normal(
            k3, (gate_out, skip_out_channels), jnp.float32),
        'bskip': jnp.zeros((1, skip_out_channels), jnp.float32),
    }


if __name__ == "__main__":
    key = jax.random.PRNGKey(0)
    dropout = 1 - 0.95

    def run_and_check(tag, x, params, K, dil, ref_out, ref_skip, tol, **kw):
        out, skip = residual_conv1d_glu(x, params, kernel_size=K,
                                        dilation=dil, **kw)
        out, skip = jax.block_until_ready((out, skip))
        assert out.shape == ref_out.shape and skip.shape == ref_skip.shape, \
            f"{tag}: shape mismatch"
        assert jnp.allclose(out.astype(jnp.float32), ref_out,
                            atol=tol, rtol=tol), f"{tag}: out mismatch {kw}"
        assert jnp.allclose(skip.astype(jnp.float32), ref_skip,
                            atol=tol, rtol=tol), f"{tag}: skip mismatch {kw}"

    # (Cres, Cgate, Cskip, K, dilation, B, T, t_block, n_chunks)
    #  cfg 0: tiny channels, 2 time chunks (halo seeded from HBM mid-signal)
    #  cfg 1: dilation=16 so the causal halo (32) > t_block (16) carry path
    #  cfg 2: lane-aligned channels (128/256/128) -> fused gate + fused 1x1
    #         path, B=1 with 2 chunks (v7x second-core style gridding)
    configs = [
        (4, 8, 4, 3, 2, 2, 40, 16, 2),
        (4, 8, 4, 3, 16, 2, 40, 16, 2),
        (128, 256, 128, 3, 4, 1, 32, 16, 2),
    ]

    for idx, (Cres, Cgate, Cskip, K, dil, B, T, tb, nc) in enumerate(configs):
        key, kx, kp = jax.random.split(key, 3)
        x = jax.random.normal(kx, (B, Cres, T), jnp.float32)
        params = init_params(kp, Cres, Cgate, K, Cskip, dropout)

        out_ref, skip_ref = reference_forward(x, params, kernel_size=K,
                                              dilation=dil)

        # bf16-rounded reference for the bf16-operand / f32-accumulation path.
        xb = x.astype(jnp.bfloat16).astype(jnp.float32)
        params_b = jax.tree_util.tree_map(
            lambda a: a.astype(jnp.bfloat16).astype(jnp.float32), params)
        out_refb, skip_refb = reference_forward(xb, params_b, kernel_size=K,
                                                dilation=dil)

        # On the lane-aligned config exercise BOTH the fused-slab and the
        # K-step accumulation (v7x-preferred) tap paths.
        tap_opts = [True, False] if Cres % 128 == 0 else [None]
        for ft in tap_opts:
            run_and_check(f"cfg{idx}/f32/taps={ft}", x, params, K, dil,
                          out_ref, skip_ref, 1e-4,
                          t_block=tb, n_chunks=nc, fuse_taps=ft,
                          compute_dtype=jnp.float32)
            run_and_check(f"cfg{idx}/bf16/taps={ft}", x, params, K, dil,
                          out_refb, skip_refb, 3e-2,
                          t_block=tb, n_chunks=nc, fuse_taps=ft,
                          compute_dtype=jnp.bfloat16)

    # Auto-defaults path (chip-dependent t_block / vmem limit / chunking).
    key, kx, kp = jax.random.split(key, 3)
    x = jax.random.normal(kx, (2, 4, 64), jnp.float32)
    params = init_params(kp, 4, 8, 3, 4, dropout)
    out_ref, skip_ref = reference_forward(x, params, kernel_size=3, dilation=2)
    run_and_check("auto-defaults", x, params, 3, 2, out_ref, skip_ref, 1e-4,
                  compute_dtype=jnp.float32)

    print("KERNEL_OK")
</pallas_src>

<mosaic_0001>
module attributes {stable_mosaic.version = 11 : i64} {
  func.func @_glu_block_kernel_small(%arg0: i32, %arg1: i32, %arg2: i32, %arg3: memref<1x1x8x4xf32, #tpu.memory_space<vmem>>, %arg4: memref<1x16x4xf32, #tpu.memory_space<vmem>>, %arg5: memref<12x4xf32, #tpu.memory_space<vmem>>, %arg6: memref<1x4xf32, #tpu.memory_space<vmem>>, %arg7: memref<12x4xf32, #tpu.memory_space<vmem>>, %arg8: memref<1x4xf32, #tpu.memory_space<vmem>>, %arg9: memref<4x4xf32, #tpu.memory_space<vmem>>, %arg10: memref<1x4xf32, #tpu.memory_space<vmem>>, %arg11: memref<4x4xf32, #tpu.memory_space<vmem>>, %arg12: memref<1x4xf32, #tpu.memory_space<vmem>>, %arg13: memref<1x16x4xf32, #tpu.memory_space<vmem>>, %arg14: memref<1x16x4xf32, #tpu.memory_space<vmem>>, %arg15: memref<24x4xf32, #tpu.memory_space<vmem>>) attributes {dimension_semantics = [#tpu.dimension_semantics<parallel>, #tpu.dimension_semantics<parallel>, #tpu.dimension_semantics<arbitrary>], iteration_bounds = array<i64: 2, 2, 2>, scalar_prefetch = 0 : i64, scratch_operands = 1 : i64, tpu.core_type = #tpu.core_type<tc>, window_params = [{transform_indices = @transform_0, window_bounds = array<i64: 1, 1, 8, 4>}, {transform_indices = @transform_1, window_bounds = array<i64: 1, 16, 4>}, {pipeline_mode = #tpu.pipeline_mode<synchronous>, transform_indices = @transform_2, window_bounds = array<i64: 12, 4>}, {pipeline_mode = #tpu.pipeline_mode<synchronous>, transform_indices = @transform_3, window_bounds = array<i64: 1, 4>}, {pipeline_mode = #tpu.pipeline_mode<synchronous>, transform_indices = @transform_4, window_bounds = array<i64: 12, 4>}, {pipeline_mode = #tpu.pipeline_mode<synchronous>, transform_indices = @transform_5, window_bounds = array<i64: 1, 4>}, {pipeline_mode = #tpu.pipeline_mode<synchronous>, transform_indices = @transform_6, window_bounds = array<i64: 4, 4>}, {pipeline_mode = #tpu.pipeline_mode<synchronous>, transform_indices = @transform_7, window_bounds = array<i64: 1, 4>}, {pipeline_mode = #tpu.pipeline_mode<synchronous>, transform_indices = @transform_8, window_bounds = array<i64: 4, 4>}, {pipeline_mode = #tpu.pipeline_mode<synchronous>, transform_indices = @transform_9, window_bounds = array<i64: 1, 4>}, {transform_indices = @transform_10, window_bounds = array<i64: 1, 16, 4>}, {transform_indices = @transform_11, window_bounds = array<i64: 1, 16, 4>}]} {
    %c0_i32 = arith.constant 0 : i32
    %0 = arith.cmpi eq, %arg2, %c0_i32 : i32
    %1 = arith.extui %0 : i1 to i32
    %c0_i32_0 = arith.constant 0 : i32
    %2 = arith.cmpi ne, %1, %c0_i32_0 : i32
    scf.if %2 {
      %c0_40 = arith.constant 0 : index
      %c0_41 = arith.constant 0 : index
      %c0_42 = arith.constant 0 : index
      %c0_43 = arith.constant 0 : index
      %60 = vector.load %arg3[%c0_40, %c0_41, %c0_42, %c0_43] : memref<1x1x8x4xf32, #tpu.memory_space<vmem>>, vector<1x1x8x4xf32>
      %61 = vector.shape_cast %60 : vector<1x1x8x4xf32> to vector<8x4xf32>
      %c0_44 = arith.constant 0 : index
      %c0_45 = arith.constant 0 : index
      %62 = vector.load %arg15[%c0_44, %c0_45] : memref<24x4xf32, #tpu.memory_space<vmem>>, vector<8x4xf32>
      tpu.vector_store %arg15[%c0_44, %c0_45], %61 {strides = array<i32>} : memref<24x4xf32, #tpu.memory_space<vmem>>, vector<8x4xf32>,
    } else {
    }
    %c0 = arith.constant 0 : index
    %c0_1 = arith.constant 0 : index
    %c0_2 = arith.constant 0 : index
    %3 = vector.load %arg4[%c0, %c0_1, %c0_2] : memref<1x16x4xf32, #tpu.memory_space<vmem>>, vector<1x16x4xf32>
    %4 = vector.shape_cast %3 : vector<1x16x4xf32> to vector<16x4xf32>
    %c8 = arith.constant 8 : index
    %c0_3 = arith.constant 0 : index
    %5 = vector.load %arg15[%c8, %c0_3] : memref<24x4xf32, #tpu.memory_space<vmem>>, vector<16x4xf32>
    tpu.vector_store %arg15[%c8, %c0_3], %4 {strides = array<i32>} : memref<24x4xf32, #tpu.memory_space<vmem>>, vector<16x4xf32>,
    %c0_4 = arith.constant 0 : index
    %c0_5 = arith.constant 0 : index
    %6 = vector.load %arg5[%c0_4, %c0_5] : memref<12x4xf32, #tpu.memory_space<vmem>>, vector<12x4xf32>
    %c0_6 = arith.constant 0 : index
    %c0_7 = arith.constant 0 : index
    %7 = vector.load %arg7[%c0_6, %c0_7] : memref<12x4xf32, #tpu.memory_space<vmem>>, vector<12x4xf32>
    %8 = vector.extract_strided_slice %6 {offsets = [8, 0], sizes = [4, 4], strides = [1, 1]} : vector<12x4xf32> to vector<4x4xf32>
    %cst = arith.constant dense<0.000000e+00> : vector<16x4xf32>
    %9 = tpu.matmul %4, %8, %cst {dimension_numbers = #tpu.dot_dimension_numbers<[1], [0], [0], [1], [0, 0, 1, 1], [], []>} : vector<16x4xf32>, vector<4x4xf32>, vector<16x4xf32> -> vector<16x4xf32>
    %10 = vector.extract_strided_slice %7 {offsets = [8, 0], sizes = [4, 4], strides = [1, 1]} : vector<12x4xf32> to vector<4x4xf32>
    %cst_8 = arith.constant dense<0.000000e+00> : vector<16x4xf32>
    %11 = tpu.matmul %4, %10, %cst_8 {dimension_numbers = #tpu.dot_dimension_numbers<[1], [0], [0], [1], [0, 0, 1, 1], [], []>} : vector<16x4xf32>, vector<4x4xf32>, vector<16x4xf32> -> vector<16x4xf32>
    %c4 = arith.constant 4 : index
    %c0_9 = arith.constant 0 : index
    %12 = vector.load %arg15[%c4, %c0_9] : memref<24x4xf32, #tpu.memory_space<vmem>>, vector<16x4xf32>
    %13 = vector.extract_strided_slice %6 {offsets = [0, 0], sizes = [4, 4], strides = [1, 1]} : vector<12x4xf32> to vector<4x4xf32>
    %cst_10 = arith.constant dense<0.000000e+00> : vector<16x4xf32>
    %14 = tpu.matmul %12, %13, %cst_10 {dimension_numbers = #tpu.dot_dimension_numbers<[1], [0], [0], [1], [0, 0, 1, 1], [], []>} : vector<16x4xf32>, vector<4x4xf32>, vector<16x4xf32> -> vector<16x4xf32>
    %15 = arith.addf %9, %14 : vector<16x4xf32>
    %16 = vector.extract_strided_slice %7 {offsets = [0, 0], sizes = [4, 4], strides = [1, 1]} : vector<12x4xf32> to vector<4x4xf32>
    %cst_11 = arith.constant dense<0.000000e+00> : vector<16x4xf32>
    %17 = tpu.matmul %12, %16, %cst_11 {dimension_numbers = #tpu.dot_dimension_numbers<[1], [0], [0], [1], [0, 0, 1, 1], [], []>} : vector<16x4xf32>, vector<4x4xf32>, vector<16x4xf32> -> vector<16x4xf32>
    %18 = arith.addf %11, %17 : vector<16x4xf32>
    %c6 = arith.constant 6 : index
    %c0_12 = arith.constant 0 : index
    %19 = vector.load %arg15[%c6, %c0_12] : memref<24x4xf32, #tpu.memory_space<vmem>>, vector<16x4xf32>
    %20 = vector.extract_strided_slice %6 {offsets = [4, 0], sizes = [4, 4], strides = [1, 1]} : vector<12x4xf32> to vector<4x4xf32>
    %cst_13 = arith.constant dense<0.000000e+00> : vector<16x4xf32>
    %21 = tpu.matmul %19, %20, %cst_13 {dimension_numbers = #tpu.dot_dimension_numbers<[1], [0], [0], [1], [0, 0, 1, 1], [], []>} : vector<16x4xf32>, vector<4x4xf32>, vector<16x4xf32> -> vector<16x4xf32>
    %22 = arith.addf %15, %21 : vector<16x4xf32>
    %23 = vector.extract_strided_slice %7 {offsets = [4, 0], sizes = [4, 4], strides = [1, 1]} : vector<12x4xf32> to vector<4x4xf32>
    %cst_14 = arith.constant dense<0.000000e+00> : vector<16x4xf32>
    %24 = tpu.matmul %19, %23, %cst_14 {dimension_numbers = #tpu.dot_dimension_numbers<[1], [0], [0], [1], [0, 0, 1, 1], [], []>} : vector<16x4xf32>, vector<4x4xf32>, vector<16x4xf32> -> vector<16x4xf32>
    %25 = arith.addf %18, %24 : vector<16x4xf32>
    %c20 = arith.constant 20 : index
    %c0_15 = arith.constant 0 : index
    %26 = vector.load %arg15[%c20, %c0_15] : memref<24x4xf32, #tpu.memory_space<vmem>>, vector<4x4xf32>
    %c4_16 = arith.constant 4 : index
    %c0_17 = arith.constant 0 : index
    %27 = vector.load %arg15[%c4_16, %c0_17] : memref<24x4xf32, #tpu.memory_space<vmem>>, vector<4x4xf32>
    tpu.vector_store %arg15[%c4_16, %c0_17], %26 {strides = array<i32>} : memref<24x4xf32, #tpu.memory_space<vmem>>, vector<4x4xf32>,
    %c0_18 = arith.constant 0 : index
    %c0_19 = arith.constant 0 : index
    %28 = vector.load %arg6[%c0_18, %c0_19] : memref<1x4xf32, #tpu.memory_space<vmem>>, vector<1x4xf32>
    %29 = vector.broadcast %28 : vector<1x4xf32> to vector<16x4xf32>
    %30 = arith.addf %22, %29 : vector<16x4xf32>
    %c0_20 = arith.constant 0 : index
    %c0_21 = arith.constant 0 : index
    %31 = vector.load %arg8[%c0_20, %c0_21] : memref<1x4xf32, #tpu.memory_space<vmem>>, vector<1x4xf32>
    %32 = vector.broadcast %31 : vector<1x4xf32> to vector<16x4xf32>
    %33 = arith.addf %25, %32 : vector<16x4xf32>
    %34 = math.tanh %30 : vector<16x4xf32>
    %35 = arith.negf %33 : vector<16x4xf32>
    %36 = math.exp %35 : vector<16x4xf32>
    %cst_22 = arith.constant 1.000000e+00 : f32
    %37 = vector.broadcast %cst_22 : f32 to vector<16x4xf32>
    %38 = arith.addf %37, %36 : vector<16x4xf32>
    %39 = arith.divf %37, %38 : vector<16x4xf32>
    %40 = arith.mulf %34, %39 : vector<16x4xf32>
    %c0_23 = arith.constant 0 : index
    %c0_24 = arith.constant 0 : index
    %41 = vector.load %arg11[%c0_23, %c0_24] : memref<4x4xf32, #tpu.memory_space<vmem>>, vector<4x4xf32>
    %cst_25 = arith.constant dense<0.000000e+00> : vector<16x4xf32>
    %42 = tpu.matmul %40, %41, %cst_25 {dimension_numbers = #tpu.dot_dimension_numbers<[1], [0], [0], [1], [0, 0, 1, 1], [], []>} : vector<16x4xf32>, vector<4x4xf32>, vector<16x4xf32> -> vector<16x4xf32>
    %c0_26 = arith.constant 0 : index
    %c0_27 = arith.constant 0 : index
    %43 = vector.load %arg12[%c0_26, %c0_27] : memref<1x4xf32, #tpu.memory_space<vmem>>, vector<1x4xf32>
    %44 = vector.broadcast %43 : vector<1x4xf32> to vector<16x4xf32>
    %45 = arith.addf %42, %44 : vector<16x4xf32>
    %c0_28 = arith.constant 0 : index
    %c0_29 = arith.constant 0 : index
    %46 = vector.load %arg9[%c0_28, %c0_29] : memref<4x4xf32, #tpu.memory_space<vmem>>, vector<4x4xf32>
    %cst_30 = arith.constant dense<0.000000e+00> : vector<16x4xf32>
    %47 = tpu.matmul %40, %46, %cst_30 {dimension_numbers = #tpu.dot_dimension_numbers<[1], [0], [0], [1], [0, 0, 1, 1], [], []>} : vector<16x4xf32>, vector<4x4xf32>, vector<16x4xf32> -> vector<16x4xf32>
    %c0_31 = arith.constant 0 : index
    %c0_32 = arith.constant 0 : index
    %48 = vector.load %arg10[%c0_31, %c0_32] : memref<1x4xf32, #tpu.memory_space<vmem>>, vector<1x4xf32>
    %49 = vector.broadcast %48 : vector<1x4xf32> to vector<16x4xf32>
    %50 = arith.addf %47, %49 : vector<16x4xf32>
    %51 = arith.addf %50, %4 : vector<16x4xf32>
    %cst_33 = arith.constant 0.707106769 : f32
    %52 = vector.broadcast %cst_33 : f32 to vector<16x4xf32>
    %53 = arith.mulf %51, %52 : vector<16x4xf32>
    %c0_34 = arith.constant 0 : index
    %c0_35 = arith.constant 0 : index
    %c0_36 = arith.constant 0 : index
    %54 = vector.load %arg13[%c0_34, %c0_35, %c0_36] : memref<1x16x4xf32, #tpu.memory_space<vmem>>, vector<1x16x4xf32>
    %55 = vector.shape_cast %54 : vector<1x16x4xf32> to vector<16x4xf32>
    %56 = vector.shape_cast %53 : vector<16x4xf32> to vector<1x16x4xf32>
    tpu.vector_store %arg13[%c0_34, %c0_35, %c0_36], %56 {strides = array<i32>} : memref<1x16x4xf32, #tpu.memory_space<vmem>>, vector<1x16x4xf32>,
    %c0_37 = arith.constant 0 : index
    %c0_38 = arith.constant 0 : index
    %c0_39 = arith.constant 0 : index
    %57 = vector.load %arg14[%c0_37, %c0_38, %c0_39] : memref<1x16x4xf32, #tpu.memory_space<vmem>>, vector<1x16x4xf32>
    %58 = vector.shape_cast %57 : vector<1x16x4xf32> to vector<16x4xf32>
    %59 = vector.shape_cast %45 : vector<16x4xf32> to vector<1x16x4xf32>
    tpu.vector_store %arg14[%c0_37, %c0_38, %c0_39], %59 {strides = array<i32>} : memref<1x16x4xf32, #tpu.memory_space<vmem>>, vector<1x16x4xf32>,
    return
  }
  func.func @transform_0(%arg0: i32, %arg1: i32, %arg2: i32) -> (i32, i32, i32, i32) {
    %c0_i32 = arith.constant 0 : i32
    %c0_i32_0 = arith.constant 0 : i32
    %c0_i32_1 = arith.constant 0 : i32
    return %arg0, %arg1, %c0_i32, %c0_i32_0 : i32, i32, i32, i32
  }
  func.func @transform_1(%arg0: i32, %arg1: i32, %arg2: i32) -> (i32, i32, i32) {
    %c2_i32 = arith.constant 2 : i32
    %0 = arith.muli %arg1, %c2_i32 : i32
    %1 = arith.addi %0, %arg2 : i32
    %c0_i32 = arith.constant 0 : i32
    %c0_i32_0 = arith.constant 0 : i32
    return %arg0, %1, %c0_i32 : i32, i32, i32
  }
  func.func @transform_2(%arg0: i32, %arg1: i32, %arg2: i32) -> (i32, i32) {
    %c0_i32 = arith.constant 0 : i32
    %c0_i32_0 = arith.constant 0 : i32
    %c0_i32_1 = arith.constant 0 : i32
    return %c0_i32, %c0_i32_0 : i32, i32
  }
  func.func @transform_3(%arg0: i32, %arg1: i32, %arg2: i32) -> (i32, i32) {
    %c0_i32 = arith.constant 0 : i32
    %c0_i32_0 = arith.constant 0 : i32
    %c0_i32_1 = arith.constant 0 : i32
    return %c0_i32, %c0_i32_0 : i32, i32
  }
  func.func @transform_4(%arg0: i32, %arg1: i32, %arg2: i32) -> (i32, i32) {
    %c0_i32 = arith.constant 0 : i32
    %c0_i32_0 = arith.constant 0 : i32
    %c0_i32_1 = arith.constant 0 : i32
    return %c0_i32, %c0_i32_0 : i32, i32
  }
  func.func @transform_5(%arg0: i32, %arg1: i32, %arg2: i32) -> (i32, i32) {
    %c0_i32 = arith.constant 0 : i32
    %c0_i32_0 = arith.constant 0 : i32
    %c0_i32_1 = arith.constant 0 : i32
    return %c0_i32, %c0_i32_0 : i32, i32
  }
  func.func @transform_6(%arg0: i32, %arg1: i32, %arg2: i32) -> (i32, i32) {
    %c0_i32 = arith.constant 0 : i32
    %c0_i32_0 = arith.constant 0 : i32
    %c0_i32_1 = arith.constant 0 : i32
    return %c0_i32, %c0_i32_0 : i32, i32
  }
  func.func @transform_7(%arg0: i32, %arg1: i32, %arg2: i32) -> (i32, i32) {
    %c0_i32 = arith.constant 0 : i32
    %c0_i32_0 = arith.constant 0 : i32
    %c0_i32_1 = arith.constant 0 : i32
    return %c0_i32, %c0_i32_0 : i32, i32
  }
  func.func @transform_8(%arg0: i32, %arg1: i32, %arg2: i32) -> (i32, i32) {
    %c0_i32 = arith.constant 0 : i32
    %c0_i32_0 = arith.constant 0 : i32
    %c0_i32_1 = arith.constant 0 : i32
    return %c0_i32, %c0_i32_0 : i32, i32
  }
  func.func @transform_9(%arg0: i32, %arg1: i32, %arg2: i32) -> (i32, i32) {
    %c0_i32 = arith.constant 0 : i32
    %c0_i32_0 = arith.constant 0 : i32
    %c0_i32_1 = arith.constant 0 : i32
    return %c0_i32, %c0_i32_0 : i32, i32
  }
  func.func @transform_10(%arg0: i32, %arg1: i32, %arg2: i32) -> (i32, i32, i32) {
    %c2_i32 = arith.constant 2 : i32
    %0 = arith.muli %arg1, %c2_i32 : i32
    %1 = arith.addi %0, %arg2 : i32
    %c0_i32 = arith.constant 0 : i32
    %c0_i32_0 = arith.constant 0 : i32
    return %arg0, %1, %c0_i32 : i32, i32, i32
  }
  func.func @transform_11(%arg0: i32, %arg1: i32, %arg2: i32) -> (i32, i32, i32) {
    %c2_i32 = arith.constant 2 : i32
    %0 = arith.muli %arg1, %c2_i32 : i32
    %1 = arith.addi %0, %arg2 : i32
    %c0_i32 = arith.constant 0 : i32
    %c0_i32_0 = arith.constant 0 : i32
    return %arg0, %1, %c0_i32 : i32, i32, i32
  }
}

</mosaic_0001>

<bundles_post_ra>
// kernel: tpu_custom_call.1
= control target key start
LH: loop header
LB: loop body
LE: loop exit
PB: predicated region body
PF: predicated region fallthrough
CT: control target
= control target key end

     0   :  { %s1746_s17 = smov 0   ;;  %s1748_s18 = smov 0   ;;  %s1913_s0 = inlined_call_operand.vmem [shape: f32[2,2,8,4], index: 0, kind: input, shape index: {}]   ;;  %s1914_s1 = inlined_call_operand.vmem [shape: f32[2,64,4], index: 1, kind: input, shape index: {}]   ;;  %s1915_s2 = inlined_call_operand.vmem [shape: f32[12,4], index: 2, kind: input, shape index: {}]   ;;  %s1916_s3 = inlined_call_operand.vmem [shape: f32[1,4], index: 3, kind: input, shape index: {}]   ;;  %s1917_s4 = inlined_call_operand.vmem [shape: f32[12,4], index: 4, kind: input, shape index: {}]   ;;  %s1918_s5 = inlined_call_operand.vmem [shape: f32[1,4], index: 5, kind: input, shape index: {}]   ;;  %s1919_s6 = inlined_call_operand.vmem [shape: f32[4,4], index: 6, kind: input, shape index: {}]   ;;  %s1920_s7 = inlined_call_operand.vmem [shape: f32[1,4], index: 7, kind: input, shape index: {}]   ;;  %s1921_s8 = inlined_call_operand.vmem [shape: f32[4,4], index: 8, kind: input, shape index: {}]   ;;  %s1922_s9 = inlined_call_operand.vmem [shape: f32[1,4], index: 9, kind: input, shape index: {}]   ;;  %s1923_s10 = inlined_call_operand.vmem [shape: f32[2,64,4], index: 10, kind: output, shape index: {0}]   ;;  %s1924_s11 = inlined_call_operand.vmem [shape: f32[2,64,4], index: 11, kind: output, shape index: {1}]  }
   0x1   :  { %1929 = sst [smem:[#allocation10_spill]] %s1920_s7  ;;  %s1750_s19 = smov 0  }
   0x2   :  { %s1752_s20 = smov 0   ;;  %s1754_s21 = smov 0  }
   0x3   :  { %s1756_s22 = smov 0   ;;  %s1758_s23 = smov 0  }
   0x4 LB: > { %1930 = sst [smem:[#allocation3_spill]] %s1672_s20  ;;  %s34_s24 = sadd.s32 1, %s1672_s20  ;;  %s1684_s23 = sphi %s1758_s23, %s22_s23   ;;  %s1680_s22 = sphi %s1756_s22, %s1944_s22   ;;  %s1676_s21 = sphi %s1754_s21, %s1943_s21   ;;  %s1672_s20 = sphi %s1752_s20, %s1942_s20   ;;  %s1668_s19 = sphi %s1750_s19, %s1941_s19   ;;  %s1664_s18 = sphi %s1748_s18, %s1940_s18   ;;  %s1660_s17 = sphi %s1746_s17, %s1939_s17  }
   0x5   : > { %1931 = sst [smem:[#allocation4_spill]] %s1676_s21  ;;  %p35_p0 = scmp.ge.s32.totalorder %s34_s24, 2 }
   0x6   : > { %1932 = sst [smem:[#allocation5_spill]] %s1680_s22  ;;  %s37_s25 = sadd.s32 1, %s1676_s21 }
   0x7   : > { %1933 = sst [smem:[#allocation6_spill]] %s1684_s23  ;;  %p1442_p1 = scmp.ge.s32.totalorder %s1684_s23, 1 }
   0x8   : > { %p401_p2 = scmp.lt.s32.totalorder %s1684_s23, 9  ;;  %s1946_s24 = smov (%p35_p0, %s34_s24), 0 }
   0x9   : > { %1934 = sst [smem:[#allocation7_spill]] %s1946_s24  ;;  %s1948_s25 = smov (!%p35_p0, %s37_s25), %s1676_s21 }
   0xa   : > { %p402_p3 = pnand %p1442_p1, %p401_p2  ;;  %p39_p4 = scmp.ge.s32.totalorder %s1948_s25, 2 }
   0xb   : > { %s41_s26 = sadd.s32 1, %s1680_s22  ;;  %p472_p6 = scmp.lt.s32.totalorder (!%p402_p3), %s1668_s19, 1 }
   0xc   : > { %s1950_s25 = smov (%p39_p4, %s1948_s25), 0  ;;  %s1952_s26 = smov (!%p39_p4, %s41_s26), %s1680_s22 }
   0xd   : > { %1935 = sst [smem:[#allocation8_spill]] %s1950_s25  ;;  %p43_p5 = scmp.ge.s32.totalorder %s1952_s26, 2 }
   0xe   : > { %405 = sbr.rel (%p402_p3) target bundleno = 526 (0x20e), region = 60  ;;  %p474_p7 = scmp.lt.s32.totalorder (!%p402_p3), %s1664_s18, 1 }
   0xf   : > { %s1954_s26 = smov (%p43_p5, %s1952_s26), 0  ;;  %s1445_s27 = sshll.u32 (!%p402_p3), %s1664_s18, 1 }
  0x10   : > { %1936 = sst [smem:[#allocation9_spill]] %s1954_s26  ;;  %s481_s29 = sadd.s32 (!%p402_p3), %s1660_s17, %s1445_s27 }
  0x11   : > { %s1446_s12 = sshll.u32 (!%p402_p3), %s481_s29, 1  ;;  %p1457_p9 = scmp.ne.s32.totalorder (!%p402_p3), %s1660_s17, 0 }
  0x12   : > { %p485_p8 = scmp.lt.s32.totalorder (!%p402_p3), %s1446_s12, 7 }
  0x15   : > { %s1956_s19 = smov (!%p472_p6, %s1668_s19), 1  ;;  %s1958_s18 = smov (!%p474_p7, %s1664_s18), 1 }
  0x16   : > { %s1443_s28 = sshll.u32 %s1956_s19, 1  ;;  %s1447_s25 = sshll.u32 %s1956_s19, 3  ;;  %vm527_vm0 = vcmask (!%p1457_p9), 31744  }
  0x17   : > { %s477_s30 = sadd.s32 %s1443_s28, %s1958_s18  ;;  %s1960_s12 = smov (!%p485_p8, %s1446_s12), 7 }
  0x18   : > { %s1444_s13 = sshll.u32 %s477_s30, 3  ;;  %s488_s26 = sadd.s32 %s1447_s25, %s1960_s12 }
  0x19   : > { %s479_s16 = scalar_lea.vmem %s1913_s0, %s1444_s13  ;;  %s1448_s24 = sshll.u32 %s488_s26, 3 }
  0x1a   : > { %s490_s20 = scalar_lea.vmem %s1914_s1, %s1448_s24  ;;  %s1800_s27 = scalar_lea.vmem %s1923_s10, %s1448_s24  ;;  %v526_v0 = vld [vmem:[%s479_s16] sm:$0xff] (!%p1457_p9) }
  0x1b   : > { %s1805_s29 = scalar_lea.vmem %s1924_s11, %s1448_s24  ;;  %525 = sbr.rel (%p1457_p9) target bundleno = 34 (0x22), region = 64  ;;  %528 = vst.msk [vmem:[#allocation2] sm:$0xff] (!%p1457_p9), %vm527_vm0, %v526_v0 }
  0x22 PF: > { %v536_v1 = vld [vmem:[%s1917_s4] sm:$0xff]  ;;  %vm546_vm1 = vcmask 1043456   ;;  %vm531_vm2 = vcmask 31744   ;;  %v537_v4 = vld [vmem:[%s1917_s4 + $0x8] sm:$0xf]  ;;  %vm1034_vm3 = vcmask 27648  }
  0x23   : > { %v534_v2 = vld [vmem:[%s1915_s2] sm:$0xff]  ;;  %1524 = vmatprep.subr.msk.mxu1 %vm546_vm1, %v536_v1  ;;  %v1823_v5 = vld [vmem:[%s490_s20 + $0x8] sm:$0xff]  ;;  %v953_v8 = vrot.slane %v536_v1, 4  ;;  %s1937_s7 = sld [smem:[#allocation10_spill]] }
  0x24   : > { %v1814_v3 = vld [vmem:[%s490_s20] sm:$0xff]  ;;  %1514 = vmatprep.subr.msk.mxu0 %vm546_vm1, %v534_v2  ;;  %1525 = vmatpush3.msk.msra.mxu1 %vm546_vm1, %v536_v1  ;;  %533 = vst.msk [vmem:[#allocation2 + $0x10] sm:$0xff] %vm531_vm2, %v1823_v5  ;;  %v535_v6 = vld [vmem:[%s1915_s2 + $0x8] sm:$0xf]  ;;  %v867_v9 = vrot.slane %v534_v2, 4 }
  0x25   : > { %532 = vst.msk [vmem:[#allocation2 + $0x8] sm:$0xff] %vm531_vm2, %v1814_v3  ;;  %1515 = vmatpush3.msk.msra.mxu0 %vm546_vm1, %v534_v2  ;;  %1529 = vmatprep.subr.msk.mxu1 %vm546_vm1, %v537_v4  ;;  %v1162_v14 = vld [vmem:[%s1919_s6] sm:$0xf] }
  0x26   : > { %1519 = vmatprep.subr.msk.mxu0 %vm546_vm1, %v535_v6  ;;  %v1070_v15 = vld [vmem:[%s1921_s8] sm:$0xf] }
  0x27   : > { %v1477_v16 = vld [vmem:[%s1918_s5] ss:$0 sm:$0xff] }
  0x28   : > { %v1476_v25 = vld [vmem:[%s1916_s3] ss:$0 sm:$0xff] }
  0x29   : > { %v1480_v38 = vld [vmem:[%s1922_s9] ss:$0 sm:$0xff] }
  0x2a   : > { %v1484_v39 = vld [vmem:[%s1937_s7] ss:$0 sm:$0xff] }
  0x2b   : > { %v1033_v12 = vld [vmem:[#allocation2 + $0x14] sm:$0xf] }
  0x2c   : > { %v538_v7 = vld [vmem:[#allocation2 + $0x4] sm:$0xff]  ;;  %v539_v10 = vld [vmem:[#allocation2 + $0xc] sm:$0xff] }
  0x2d   : > { %1516 = vmatprep.mubr.msk.f32.mxu0 %vm531_vm2, %v538_v7  ;;  %1526 = vmatprep.mubr.msk.f32.mxu1 %vm531_vm2, %v538_v7  ;;  %v865_v11 = vld [vmem:[#allocation2 + $0x6] sm:$0xff]  ;;  %v866_v13 = vld [vmem:[#allocation2 + $0xe] sm:$0xff] }
  0x2e   : > { %1517 = vmatmul.mubr.msk.f32.vlgmr.msra.gmra.mrb[0].mxu0 %vm531_vm2, %v539_v10  ;;  %1527 = vmatmul.mubr.msk.f32.vlgmr.msra.gmra.mrb[0].mxu1 %vm531_vm2, %v539_v10  ;;  %1035 = vst.msk [vmem:[#allocation2 + $0x4] sm:$0xf] %vm1034_vm3, %v1033_v12 }
  0x2f   : > { %1530 = vmatpush3.msk.msra.mxu1 %vm546_vm1, %v537_v4  ;;  %1520 = vmatpush3.msk.msra.mxu0 %vm546_vm1, %v535_v6 }
  0x30   : > { %1521 = vmatprep.mubr.msk.f32.mxu0 %vm531_vm2, %v1814_v3  ;;  %1531 = vmatprep.mubr.msk.f32.mxu1 %vm531_vm2, %v1814_v3 }
  0x31   : > { %1539 = vmatprep.subr.msk.mxu1 %vm546_vm1, %v953_v8  ;;  %1534 = vmatprep.subr.msk.mxu0 %vm546_vm1, %v867_v9 }
  0x36   : > { %1522 = vmatmul.mubr.msk.f32.vlgmr.msra.gmra.mrb[0].mxu0 %vm531_vm2, %v1823_v5  ;;  %1532 = vmatmul.mubr.msk.f32.vlgmr.msra.gmra.mrb[0].mxu1 %vm531_vm2, %v1823_v5 }
  0x37   : > { %1540 = vmatpush3.msk.msra.mxu1 %vm546_vm1, %v953_v8  ;;  %1535 = vmatpush3.msk.msra.mxu0 %vm546_vm1, %v867_v9 }
  0x38   : > { %1536 = vmatprep.mubr.msk.f32.mxu0 %vm531_vm2, %v865_v11  ;;  %1541 = vmatprep.mubr.msk.f32.mxu1 %vm531_vm2, %v865_v11 }
  0x39   : > { %1549 = vmatprep.subr.msk.mxu1 %vm546_vm1, %v1162_v14  ;;  %1544 = vmatprep.subr.msk.mxu0 %vm546_vm1, %v1070_v15 }
  0x3e   : > { %1537 = vmatmul.mubr.msk.f32.vlgmr.msra.gmra.mrb[0].mxu0 %vm531_vm2, %v866_v13  ;;  %1542 = vmatmul.mubr.msk.f32.vlgmr.msra.gmra.mrb[0].mxu1 %vm531_vm2, %v866_v13 }
  0x3f   : > { %1550 = vmatpush3.msk.msra.mxu1 %vm546_vm1, %v1162_v14  ;;  %1545 = vmatpush3.msk.msra.mxu0 %vm546_vm1, %v1070_v15 }
 0x111   : > { %v1538_v17 = vpop.f32.mrb[0].mxu0  ;;  %v1543_v18 = vpop.f32.mrb[0].mxu1 }
 0x112   : > { %v1053_v19 = vadd.f32 %v1543_v18, %v1477_v16  ;;  %v942_v20 = vpop.f32.mrb[1].mxu0  ;;  %v1022_v21 = vpop.f32.mrb[1].mxu1  ;;  %v1044_v26 = vadd.f32 %v1538_v17, %v1476_v25 }
 0x113   : > { %v1052_v22 = vadd.f32 %v1477_v16, %v1022_v21  ;;  %v1043_v27 = vadd.f32 %v1476_v25, %v942_v20 }
 0x114   : > { %v1479_v23 = vmul.f32 -1.442695, %v1053_v19 }
 0x115   : > { %v1478_v24 = vmul.f32 -1.442695, %v1052_v22 }
 0x116   : > { %1618 = vpow2.f32 %v1479_v23 }
 0x117   : > { %1620 = vpow2.f32 %v1478_v24 }
 0x118   : > { %1622 = vtanh.f32 %v1044_v26 }
 0x119   : > { %1624 = vtanh.f32 %v1043_v27 }
 0x120   : > { %v1619_v28 = vpop.eup %1618 }
 0x121   : > { %v1621_v29 = vpop.eup %1620  ;;  %v1063_v30 = vadd.f32 1.0, %v1619_v28 }
 0x122   : > { %v1062_v31 = vadd.f32 1.0, %v1621_v29  ;;  %v1623_v32 = vpop.eup %1622 }
 0x123   : > { %1626 = vrcp.f32 %v1063_v30  ;;  %v1625_v33 = vpop.eup %1624 }
 0x124   : > { %1628 = vrcp.f32 %v1062_v31 }
 0x12d   : > { %v1627_v34 = vpop.eup %1626 }
 0x12e   : > { %v1629_v35 = vpop.eup %1628  ;;  %v1069_v36 = vmul.f32 %v1627_v34, %v1623_v32 }
 0x12f   : > { %v1068_v37 = vmul.f32 %v1629_v35, %v1625_v33 }
 0x131   : > { %1546 = vmatprep.mubr.msk.f32.mxu0 %vm531_vm2, %v1068_v37  ;;  %1551 = vmatprep.mubr.msk.f32.mxu1 %vm531_vm2, %v1068_v37 }
 0x132   : > { %1547 = vmatmul.mubr.msk.f32.vlgmr.msra.gmra.mrb[2].mxu0 %vm531_vm2, %v1069_v36  ;;  %1552 = vmatmul.mubr.msk.f32.vlgmr.msra.gmra.mrb[2].mxu1 %vm531_vm2, %v1069_v36 }
 0x205   : > { %v1548_v40 = vpop.f32.mrb[2].mxu0  ;;  %v1553_v41 = vpop.f32.mrb[2].mxu1 }
 0x206   : > { %v1159_v42 = vadd.f32 %v1548_v40, %v1480_v38  ;;  %v1245_v43 = vadd.f32 %v1553_v41, %v1484_v39  ;;  %v1153_v44 = vpop.f32.mrb[3].mxu0  ;;  %v1239_v45 = vpop.f32.mrb[3].mxu1 }
 0x207   : > { %v1154_v46 = vadd.f32 %v1480_v38, %v1153_v44  ;;  %v1240_v47 = vadd.f32 %v1484_v39, %v1239_v45 }
 0x208   : > { %1255 = vst.msk [vmem:[%s1805_s29 + $0x8] sm:$0xff] %vm531_vm2, %v1159_v42  ;;  %v1249_v48 = vadd.f32 %v1245_v43, %v1823_v5 }
 0x209   : > { %1254 = vst.msk [vmem:[%s1805_s29] sm:$0xff] %vm531_vm2, %v1154_v46  ;;  %v1248_v49 = vadd.f32 %v1240_v47, %v1814_v3 }
 0x20a   : > { %v1251_v50 = vmul.f32 0.70710677, %v1249_v48 }
 0x20b   : > { %v1250_v51 = vmul.f32 0.70710677, %v1248_v49 }
 0x20c   : > { %1253 = vst.msk [vmem:[%s1800_s27 + $0x8] sm:$0xff] %vm531_vm2, %v1251_v50 }
 0x20d   : > { %1252 = vst.msk [vmem:[%s1800_s27] sm:$0xff] %vm531_vm2, %v1250_v51 }
 0x20e PF: > { %s1938_s22 = sld [smem:[#allocation6_spill]]  ;;  %s1939_s17 = sld [smem:[#allocation3_spill]] }
 0x20f   : > { %s1940_s18 = sld [smem:[#allocation4_spill]]  ;;  %s1941_s19 = sld [smem:[#allocation5_spill]] }
 0x210   : > { %s1942_s20 = sld [smem:[#allocation7_spill]]  ;;  %s1943_s21 = sld [smem:[#allocation8_spill]] }
 0x214   : > { %s22_s23 = sadd.s32 1, %s1938_s22   ;;  %s1944_s22 = sld [smem:[#allocation9_spill]] }
 0x215   : > { %p19_p10 = scmp.ge.s32.totalorder %s22_s23, 10  }
 0x217   :  { %21 = sbr.rel (!%p19_p10) target bundleno = 4 (0x4), region = 109 }

</bundles_post_ra>
